<compile_context>
chip_gen: v7x
topology: tpu7x:2x2x1
jax: 0.10.0
libtpu: 0.0.40
codegen_flags: <defaults>
</compile_context>

<pallas_src>
import functools

import jax
import jax.numpy as jnp
from jax.experimental import pallas as pl
from jax.experimental.pallas import tpu as pltpu

# TODO(synk): UER LayerNorm eps; PyTorch nn.LayerNorm default is 1e-5 — verify vs. checkpoint.
LN_EPS = 1e-6


def _pick_tile(dim, target):
    """Largest power-of-two-ish tile <= target that divides dim; full dim if it already fits."""
    if dim <= target:
        return dim
    t = target
    while t > 1:
        if dim % t == 0:
            return t
        t //= 2
    return dim


def _tile_pad(dim, target):
    """Return (tile, padded_dim). dim <= target -> single full block; else pad dim up to a tile multiple."""
    if dim <= target:
        return dim, dim
    padded = -(-dim // target) * target
    return target, padded


# ------------------ fused (LayerNorm) -> matmul -> (bias / GELU / residual) ------------------

def _fused_matmul_kernel(*args, has_ln, has_res, activation, eps):
    idx = 0
    x_ref = args[idx]; idx += 1
    if has_ln:
        g_ref, bln_ref = args[idx], args[idx + 1]; idx += 2
    w_ref, b_ref = args[idx], args[idx + 1]; idx += 2
    if has_res:
        r_ref = args[idx]; idx += 1
    o_ref = args[idx]; idx += 1
    acc_ref = args[idx]; idx += 1
    xn_ref = args[idx] if has_ln else None

    j_id = pl.program_id(1)
    k_id = pl.program_id(2)

    @pl.when(k_id == 0)
    def _init():
        acc_ref[...] = jnp.zeros_like(acc_ref)

    if has_ln:
        # LayerNorm needs the full hidden row -> wrapper guarantees tk == K on this path.
        # Compute once per row-tile (j == 0) and reuse for every output-N tile
        # (j axis is marked 'arbitrary' so iteration order per i is sequential from j == 0).
        @pl.when(j_id == 0)
        def _ln():
            xf = x_ref[...].astype(jnp.float32)
            mu = jnp.mean(xf, axis=-1, keepdims=True)
            xc = xf - mu
            var = jnp.mean(xc * xc, axis=-1, keepdims=True)
            xn_ref[...] = (xc * jax.lax.rsqrt(var + eps) * g_ref[...]
                           + bln_ref[...]).astype(jnp.bfloat16)
        x = xn_ref[...]
    else:
        x = x_ref[...].astype(jnp.bfloat16)

    acc_ref[...] += jnp.dot(x, w_ref[...].astype(jnp.bfloat16),
                            preferred_element_type=jnp.float32)

    @pl.when(k_id == pl.num_programs(2) - 1)
    def _finalize():
        acc = acc_ref[...] + b_ref[...].astype(jnp.float32)
        if activation == "gelu":
            # Exact erf GELU to match UER's act_fun.gelu (tanh variant would be faster on v5e).
            acc = jax.nn.gelu(acc, approximate=False)
        if has_res:
            acc = acc + r_ref[...].astype(jnp.float32)
        o_ref[...] = acc.astype(o_ref.dtype)


def fused_matmul(x, w, b, *, gamma=None, beta=None, residual=None, activation=None,
                 eps=LN_EPS, out_dtype=None, tm=512, tn=1024, tk=1024):
    """x:(M,K) @ w:(K,N) + b, with optional fused pre-LN on x and bias/GELU/residual epilogue."""
    M, K = x.shape
    Kw, N = w.shape
    assert K == Kw
    has_ln = gamma is not None
    has_res = residual is not None
    out_dtype = out_dtype or x.dtype

    tm, Mp = _tile_pad(M, tm)
    tn, Np = _tile_pad(N, tn)
    if has_ln:
        tk, Kp = K, K            # LN reduction requires the whole row in one block.
    else:
        tk, Kp = _tile_pad(K, tk)

    # Zero-pad ragged dims (exact for matmul; padded rows/cols sliced off below).
    if Mp != M:
        x = jnp.pad(x, ((0, Mp - M), (0, 0)))
        if has_res:
            residual = jnp.pad(residual, ((0, Mp - M), (0, 0)))
    if Kp != K:
        x = jnp.pad(x, ((0, 0), (0, Kp - K)))
        w = jnp.pad(w, ((0, Kp - K), (0, 0)))
    if Np != N:
        w = jnp.pad(w, ((0, 0), (0, Np - N)))
        b = jnp.pad(b, (0, Np - N))
        if has_res:
            residual = jnp.pad(residual, ((0, 0), (0, Np - N)))

    grid = (Mp // tm, Np // tn, Kp // tk)

    in_specs = [pl.BlockSpec((tm, tk), lambda i, j, k: (i, k))]
    inputs = [x]
    if has_ln:
        in_specs.append(pl.BlockSpec((1, tk), lambda i, j, k: (0, k)))
        in_specs.append(pl.BlockSpec((1, tk), lambda i, j, k: (0, k)))
        inputs.append(gamma.reshape(1, Kp).astype(jnp.float32))
        inputs.append(beta.reshape(1, Kp).astype(jnp.float32))
    in_specs.append(pl.BlockSpec((tk, tn), lambda i, j, k: (k, j)))
    in_specs.append(pl.BlockSpec((1, tn), lambda i, j, k: (0, j)))
    inputs.append(w)
    inputs.append(b.reshape(1, Np).astype(jnp.float32))
    if has_res:
        in_specs.append(pl.BlockSpec((tm, tn), lambda i, j, k: (i, j)))
        inputs.append(residual)

    scratch = [pltpu.VMEM((tm, tn), jnp.float32)]
    if has_ln:
        scratch.append(pltpu.VMEM((tm, tk), jnp.bfloat16))

    # With the LN stash, the j axis must be iterated in order per i -> mark it 'arbitrary'.
    sems = ("parallel", "arbitrary", "arbitrary") if has_ln else ("parallel", "parallel", "arbitrary")

    kernel = functools.partial(_fused_matmul_kernel, has_ln=has_ln, has_res=has_res,
                               activation=activation, eps=eps)
    out = pl.pallas_call(
        kernel,
        grid=grid,
        in_specs=in_specs,
        out_specs=pl.BlockSpec((tm, tn), lambda i, j, k: (i, j)),
        out_shape=jax.ShapeDtypeStruct((Mp, Np), out_dtype),
        scratch_shapes=scratch,
        compiler_params=pltpu.CompilerParams(
            dimension_semantics=sems,
            vmem_limit_bytes=32 * 1024 * 1024),
    )(*inputs)

    if Mp != M or Np != N:
        out = out[:M, :N]
    return out


# ------------------------------ flash-style causal attention ---------------------------------

def _flash_attn_kernel(q_ref, k_ref, v_ref, seg_ref, o_ref,
                       m_sc, l_sc, acc_sc, *, scale, num_heads, tq, tkv):
    qi = pl.program_id(1)
    ki = pl.program_id(2)

    @pl.when(ki == 0)
    def _init():
        m_sc[...] = jnp.full(m_sc.shape, -1e30, jnp.float32)
        l_sc[...] = jnp.zeros(l_sc.shape, jnp.float32)
        acc_sc[...] = jnp.zeros(acc_sc.shape, jnp.float32)

    # Skip KV tiles that lie entirely above the causal diagonal (roughly halves attention work).
    @pl.when(ki * tkv <= qi * tq + (tq - 1))
    def _compute():
        # Causal + key-padding mask built in-kernel (UER: scores += (1 - mask) * -10000).
        q_pos = qi * tq + jax.lax.broadcasted_iota(jnp.int32, (tq, tkv), 0)
        k_pos = ki * tkv + jax.lax.broadcasted_iota(jnp.int32, (tq, tkv), 1)
        keep = jnp.logical_and(k_pos <= q_pos, seg_ref[...] > 0)          # (tq, tkv)
        neg = jnp.where(keep, 0.0, -10000.0).astype(jnp.float32)

        for h in range(num_heads):
            # Per-head 2-D tiles read straight from the (B, S, 3, NH, D) QKV buffer.
            qh = q_ref[0, :, 0, h, :]                                      # (tq, D)  bf16
            kh = k_ref[0, :, 0, h, :]                                      # (tkv, D) bf16
            vh = v_ref[0, :, 0, h, :]                                      # (tkv, D) bf16
            # Fold softmax scale into q (tq*D muls instead of tq*tkv on the scores).
            qh = (qh.astype(jnp.float32) * scale).astype(jnp.bfloat16)

            s = jax.lax.dot_general(qh, kh, (((1,), (1,)), ((), ())),
                                    preferred_element_type=jnp.float32)   # (tq, tkv)
            s = s + neg

            m_prev = m_sc[h]                                               # (tq, 1)
            m_new = jnp.maximum(m_prev, jnp.max(s, axis=-1, keepdims=True))
            alpha = jnp.exp(m_prev - m_new)
            p = jnp.exp(s - m_new)
            l_sc[h] = alpha * l_sc[h] + jnp.sum(p, axis=-1, keepdims=True)
            acc_sc[h] = alpha * acc_sc[h] + jnp.dot(p.astype(vh.dtype), vh,
                                                    preferred_element_type=jnp.float32)
            m_sc[h] = m_new

    @pl.when(ki == pl.num_programs(2) - 1)
    def _finalize():
        outs = []
        for h in range(num_heads):
            inv = pl.reciprocal(l_sc[h], approx=True)
            outs.append((acc_sc[h] * inv).astype(o_ref.dtype))
        # Lane-dense (tq, NH*D) store — heads already merged, no wrapper transpose needed.
        o_ref[0] = jnp.concatenate(outs, axis=-1)


def flash_attention(qkv, seg, *, scale, tq=256, tkv=256):
    """qkv: (B, S, 3, NH, D) bf16 (free view of the fused QKV matmul output, [q|k|v] slabs,
    head-major within each slab); seg: (B, S) int32.  Returns context (B, S, NH*D) bf16."""
    B, S, _, NH, D = qkv.shape
    H = NH * D
    tq = _pick_tile(S, tq)
    tkv = _pick_tile(S, tkv)
    grid = (B, S // tq, S // tkv)

    q_spec = pl.BlockSpec((1, tq, 1, NH, D), lambda b, qi, ki: (b, qi, 0, 0, 0))
    k_spec = pl.BlockSpec((1, tkv, 1, NH, D), lambda b, qi, ki: (b, ki, 1, 0, 0))
    v_spec = pl.BlockSpec((1, tkv, 1, NH, D), lambda b, qi, ki: (b, ki, 2, 0, 0))
    seg_spec = pl.BlockSpec((1, tkv), lambda b, qi, ki: (b, ki))
    out_spec = pl.BlockSpec((1, tq, H), lambda b, qi, ki: (b, qi, 0))

    kernel = functools.partial(_flash_attn_kernel, scale=scale, num_heads=NH, tq=tq, tkv=tkv)
    return pl.pallas_call(
        kernel,
        grid=grid,
        in_specs=[q_spec, k_spec, v_spec, seg_spec],
        out_specs=out_spec,
        out_shape=jax.ShapeDtypeStruct((B, S, H), qkv.dtype),
        scratch_shapes=[pltpu.VMEM((NH, tq, 1), jnp.float32),   # running max
                        pltpu.VMEM((NH, tq, 1), jnp.float32),   # running denom
                        pltpu.VMEM((NH, tq, D), jnp.float32)],  # accumulator
        compiler_params=pltpu.CompilerParams(
            dimension_semantics=("parallel", "parallel", "arbitrary")),
    )(qkv, qkv, qkv, seg)


# --------------------------- parameter init (deterministic) ----------------------------------

def init_params(key, *, vocab, hidden, num_layers, num_heads, ffn, max_seq):
    def normal(k, shape, std=0.02):
        # Weights kept in bf16 so the K-streamed W DMA (dominant HBM traffic) is half-width.
        return (std * jax.random.normal(k, shape, dtype=jnp.float32)).astype(jnp.bfloat16)

    keys = jax.random.split(key, 3 + num_layers)
    params = {
        "word_emb": normal(keys[0], (vocab, hidden)),
        "pos_emb": normal(keys[1], (max_seq, hidden)),
        "lnf_g": jnp.ones((hidden,), jnp.float32),
        "lnf_b": jnp.zeros((hidden,), jnp.float32),
        "lm_w": normal(keys[2], (hidden, vocab)),
        "lm_b": jnp.zeros((vocab,), jnp.float32),
        "num_heads": num_heads,
        "layers": [],
    }
    for li in range(num_layers):
        ks = jax.random.split(keys[3 + li], 4)
        params["layers"].append({
            "ln1_g": jnp.ones((hidden,), jnp.float32),
            "ln1_b": jnp.zeros((hidden,), jnp.float32),
            # [Wq | Wk | Wv] fused, each slab head-major (head h = columns h*D..(h+1)*D).
            "w_qkv": normal(ks[0], (hidden, 3 * hidden)),
            "b_qkv": jnp.zeros((3 * hidden,), jnp.float32),
            "wo": normal(ks[1], (hidden, hidden)),
            "bo": jnp.zeros((hidden,), jnp.float32),
            "ln2_g": jnp.ones((hidden,), jnp.float32),
            "ln2_b": jnp.zeros((hidden,), jnp.float32),
            "w1": normal(ks[2], (hidden, ffn)),
            "b1": jnp.zeros((ffn,), jnp.float32),
            "w2": normal(ks[3], (ffn, hidden)),
            "b2": jnp.zeros((hidden,), jnp.float32),
        })
    return params


# ----------------------------------------- forward -------------------------------------------

def generate_lm_forward(params, src, seg):
    B, S = src.shape
    H = params["word_emb"].shape[1]
    heads = params["num_heads"]
    head_dim = H // heads
    scale = float(head_dim) ** -0.5

    # Embedding: word + position lookup.
    # TODO(synk): data-dependent embedding gather has no clean rectangular BlockSpec; jnp.take glue.
    emb = jnp.take(params["word_emb"], src, axis=0) + params["pos_emb"][:S][None, :, :]
    x2d = emb.reshape(B * S, H).astype(jnp.bfloat16)

    for layer in params["layers"]:
        # --- pre-LN multi-head causal self-attention ---
        # Fused LN1 + QKV projection: one (H, 3H) matmul, one kernel, one HBM read of x.
        qkv = fused_matmul(x2d, layer["w_qkv"], layer["b_qkv"],
                           gamma=layer["ln1_g"], beta=layer["ln1_b"])
        # (B*S, 3H) -> (B, S, 3, NH, D) is a FREE reshape (no transpose, no HBM relayout);
        # the attention kernel picks q/k/v slabs and heads via BlockSpec index_maps.
        qkv5 = qkv.reshape(B, S, 3, heads, head_dim)
        ctx = flash_attention(qkv5, seg, scale=scale)        # (B, S, H), heads already merged
        ctx2d = ctx.reshape(B * S, H)                         # free reshape
        # Output projection with the residual add fused into the matmul epilogue.
        x2d = fused_matmul(ctx2d, layer["wo"], layer["bo"], residual=x2d)

        # --- pre-LN feed-forward (exact erf GELU) ---
        ff = fused_matmul(x2d, layer["w1"], layer["b1"],
                          gamma=layer["ln2_g"], beta=layer["ln2_b"], activation="gelu")
        x2d = fused_matmul(ff, layer["w2"], layer["b2"], residual=x2d)

    # Final LayerNorm fused into the vocab-tiled LM head (target.lm.output_layer).
    # TODO(synk): for decode, slice x2d to the last position per sequence before this matmul.
    logits = fused_matmul(x2d, params["lm_w"], params["lm_b"],
                          gamma=params["lnf_g"], beta=params["lnf_b"],
                          out_dtype=jnp.float32)
    return logits.reshape(B, S, -1)


# ------------------------------------------- main ---------------------------------------------

if __name__ == "__main__":
    B, S, H, HEADS, LAYERS, FFN, VOCAB, MAX_SEQ = 2, 8, 32, 2, 2, 64, 64, 32

    key = jax.random.PRNGKey(0)
    pkey, skey = jax.random.split(key)
    params = init_params(pkey, vocab=VOCAB, hidden=H, num_layers=LAYERS,
                         num_heads=HEADS, ffn=FFN, max_seq=MAX_SEQ)

    src = jax.random.randint(skey, (B, S), 0, VOCAB, dtype=jnp.int32)
    seg = jnp.ones((B, S), dtype=jnp.int32)

    logits = generate_lm_forward(params, src, seg)
    jax.block_until_ready(logits)

    assert logits.shape == (B, S, VOCAB)
    assert logits.dtype == jnp.float32
    assert bool(jnp.all(jnp.isfinite(logits)))
    print("KERNEL_OK")
</pallas_src>

<mosaic_0001>
module attributes {stable_mosaic.version = 11 : i64} {
  func.func @_fused_matmul_kernel(%arg0: i32, %arg1: i32, %arg2: i32, %arg3: memref<16x32xbf16, #tpu.memory_space<vmem>>, %arg4: memref<1x32xf32, #tpu.memory_space<vmem>>, %arg5: memref<1x32xf32, #tpu.memory_space<vmem>>, %arg6: memref<32x96xbf16, #tpu.memory_space<vmem>>, %arg7: memref<1x96xf32, #tpu.memory_space<vmem>>, %arg8: memref<16x96xbf16, #tpu.memory_space<vmem>>, %arg9: memref<16x96xf32, #tpu.memory_space<vmem>>, %arg10: memref<16x32xbf16, #tpu.memory_space<vmem>>) attributes {dimension_semantics = [#tpu.dimension_semantics<parallel>, #tpu.dimension_semantics<arbitrary>, #tpu.dimension_semantics<arbitrary>], iteration_bounds = array<i64: 1, 1, 1>, scalar_prefetch = 0 : i64, scratch_operands = 2 : i64, tpu.core_type = #tpu.core_type<tc>, window_params = [{transform_indices = @transform_0, window_bounds = array<i64: 16, 32>}, {transform_indices = @transform_1, window_bounds = array<i64: 1, 32>}, {transform_indices = @transform_2, window_bounds = array<i64: 1, 32>}, {transform_indices = @transform_3, window_bounds = array<i64: 32, 96>}, {transform_indices = @transform_4, window_bounds = array<i64: 1, 96>}, {transform_indices = @transform_5, window_bounds = array<i64: 16, 96>}]} {
    %c0_i32 = arith.constant 0 : i32
    %0 = arith.cmpi eq, %arg2, %c0_i32 : i32
    %1 = arith.extui %0 : i1 to i32
    %c0_i32_0 = arith.constant 0 : i32
    %2 = arith.cmpi ne, %1, %c0_i32_0 : i32
    scf.if %2 {
      %cst_12 = arith.constant 0.000000e+00 : f32
      %15 = vector.broadcast %cst_12 : f32 to vector<16x96xf32>
      %c0_13 = arith.constant 0 : index
      %c0_14 = arith.constant 0 : index
      %16 = vector.load %arg9[%c0_13, %c0_14] : memref<16x96xf32, #tpu.memory_space<vmem>>, vector<16x96xf32>
      tpu.vector_store %arg9[%c0_13, %c0_14], %15 {strides = array<i32>} : memref<16x96xf32, #tpu.memory_space<vmem>>, vector<16x96xf32>,
    } else {
    }
    %c0_i32_1 = arith.constant 0 : i32
    %3 = arith.cmpi eq, %arg1, %c0_i32_1 : i32
    %4 = arith.extui %3 : i1 to i32
    %c0_i32_2 = arith.constant 0 : i32
    %5 = arith.cmpi ne, %4, %c0_i32_2 : i32
    scf.if %5 {
      %c0_12 = arith.constant 0 : index
      %c0_13 = arith.constant 0 : index
      %15 = vector.load %arg3[%c0_12, %c0_13] : memref<16x32xbf16, #tpu.memory_space<vmem>>, vector<16x32xbf16>
      %16 = arith.extf %15 : vector<16x32xbf16> to vector<16x32xf32>
      %cst_14 = arith.constant dense<0.000000e+00> : vector<16xf32>
      %17 = vector.multi_reduction <add>, %16, %cst_14 [1] : vector<16x32xf32> to vector<16xf32>
      %18 = vector.shape_cast %17 : vector<16xf32> to vector<16x1xf32>
      %cst_15 = arith.constant 3.200000e+01 : f32
      %19 = vector.broadcast %cst_15 : f32 to vector<16x1xf32>
      %20 = arith.divf %18, %19 : vector<16x1xf32>
      %21 = vector.broadcast %20 : vector<16x1xf32> to vector<16x32xf32>
      %22 = arith.subf %16, %21 : vector<16x32xf32>
      %23 = arith.mulf %22, %22 : vector<16x32xf32>
      %cst_16 = arith.constant dense<0.000000e+00> : vector<16xf32>
      %24 = vector.multi_reduction <add>, %23, %cst_16 [1] : vector<16x32xf32> to vector<16xf32>
      %25 = vector.shape_cast %24 : vector<16xf32> to vector<16x1xf32>
      %cst_17 = arith.constant 3.200000e+01 : f32
      %26 = vector.broadcast %cst_17 : f32 to vector<16x1xf32>
      %27 = arith.divf %25, %26 : vector<16x1xf32>
      %cst_18 = arith.constant 9.99999997E-7 : f32
      %28 = vector.broadcast %cst_18 : f32 to vector<16x1xf32>
      %29 = arith.addf %27, %28 : vector<16x1xf32>
      %30 = math.rsqrt %29 : vector<16x1xf32>
      %31 = vector.broadcast %30 : vector<16x1xf32> to vector<16x32xf32>
      %32 = arith.mulf %22, %31 : vector<16x32xf32>
      %c0_19 = arith.constant 0 : index
      %c0_20 = arith.constant 0 : index
      %33 = vector.load %arg4[%c0_19, %c0_20] : memref<1x32xf32, #tpu.memory_space<vmem>>, vector<1x32xf32>
      %34 = vector.broadcast %33 : vector<1x32xf32> to vector<16x32xf32>
      %35 = arith.mulf %32, %34 : vector<16x32xf32>
      %c0_21 = arith.constant 0 : index
      %c0_22 = arith.constant 0 : index
      %36 = vector.load %arg5[%c0_21, %c0_22] : memref<1x32xf32, #tpu.memory_space<vmem>>, vector<1x32xf32>
      %37 = vector.broadcast %36 : vector<1x32xf32> to vector<16x32xf32>
      %38 = arith.addf %35, %37 : vector<16x32xf32>
      %39 = arith.truncf %38 : vector<16x32xf32> to vector<16x32xbf16>
      %c0_23 = arith.constant 0 : index
      %c0_24 = arith.constant 0 : index
      %40 = vector.load %arg10[%c0_23, %c0_24] : memref<16x32xbf16, #tpu.memory_space<vmem>>, vector<16x32xbf16>
      tpu.vector_store %arg10[%c0_23, %c0_24], %39 {strides = array<i32>} : memref<16x32xbf16, #tpu.memory_space<vmem>>, vector<16x32xbf16>,
    } else {
    }
    %c0 = arith.constant 0 : index
    %c0_3 = arith.constant 0 : index
    %6 = vector.load %arg10[%c0, %c0_3] : memref<16x32xbf16, #tpu.memory_space<vmem>>, vector<16x32xbf16>
    %c0_4 = arith.constant 0 : index
    %c0_5 = arith.constant 0 : index
    %7 = vector.load %arg9[%c0_4, %c0_5] : memref<16x96xf32, #tpu.memory_space<vmem>>, vector<16x96xf32>
    %c0_6 = arith.constant 0 : index
    %c0_7 = arith.constant 0 : index
    %8 = vector.load %arg6[%c0_6, %c0_7] : memref<32x96xbf16, #tpu.memory_space<vmem>>, vector<32x96xbf16>
    %cst = arith.constant dense<0.000000e+00> : vector<16x96xf32>
    %9 = tpu.matmul %6, %8, %cst {dimension_numbers = #tpu.dot_dimension_numbers<[1], [0], [0], [1], [0, 0, 1, 1], [], []>} : vector<16x32xbf16>, vector<32x96xbf16>, vector<16x96xf32> -> vector<16x96xf32>
    %10 = arith.addf %7, %9 : vector<16x96xf32>
    %c0_8 = arith.constant 0 : index
    %c0_9 = arith.constant 0 : index
    %11 = vector.load %arg9[%c0_8, %c0_9] : memref<16x96xf32, #tpu.memory_space<vmem>>, vector<16x96xf32>
    tpu.vector_store %arg9[%c0_8, %c0_9], %10 {strides = array<i32>} : memref<16x96xf32, #tpu.memory_space<vmem>>, vector<16x96xf32>,
    %c0_i32_10 = arith.constant 0 : i32
    %12 = arith.cmpi eq, %arg2, %c0_i32_10 : i32
    %13 = arith.extui %12 : i1 to i32
    %c0_i32_11 = arith.constant 0 : i32
    %14 = arith.cmpi ne, %13, %c0_i32_11 : i32
    scf.if %14 {
      %c0_12 = arith.constant 0 : index
      %c0_13 = arith.constant 0 : index
      %15 = vector.load %arg9[%c0_12, %c0_13] : memref<16x96xf32, #tpu.memory_space<vmem>>, vector<16x96xf32>
      %c0_14 = arith.constant 0 : index
      %c0_15 = arith.constant 0 : index
      %16 = vector.load %arg7[%c0_14, %c0_15] : memref<1x96xf32, #tpu.memory_space<vmem>>, vector<1x96xf32>
      %17 = vector.broadcast %16 : vector<1x96xf32> to vector<16x96xf32>
      %18 = arith.addf %15, %17 : vector<16x96xf32>
      %19 = arith.truncf %18 : vector<16x96xf32> to vector<16x96xbf16>
      %c0_16 = arith.constant 0 : index
      %c0_17 = arith.constant 0 : index
      %20 = vector.load %arg8[%c0_16, %c0_17] : memref<16x96xbf16, #tpu.memory_space<vmem>>, vector<16x96xbf16>
      tpu.vector_store %arg8[%c0_16, %c0_17], %19 {strides = array<i32>} : memref<16x96xbf16, #tpu.memory_space<vmem>>, vector<16x96xbf16>,
    } else {
    }
    return
  }
  func.func @transform_0(%arg0: i32, %arg1: i32, %arg2: i32) -> (i32, i32) {
    %c0_i32 = arith.constant 0 : i32
    return %arg0, %arg2 : i32, i32
  }
  func.func @transform_1(%arg0: i32, %arg1: i32, %arg2: i32) -> (i32, i32) {
    %c0_i32 = arith.constant 0 : i32
    %c0_i32_0 = arith.constant 0 : i32
    return %c0_i32, %arg2 : i32, i32
  }
  func.func @transform_2(%arg0: i32, %arg1: i32, %arg2: i32) -> (i32, i32) {
    %c0_i32 = arith.constant 0 : i32
    %c0_i32_0 = arith.constant 0 : i32
    return %c0_i32, %arg2 : i32, i32
  }
  func.func @transform_3(%arg0: i32, %arg1: i32, %arg2: i32) -> (i32, i32) {
    %c0_i32 = arith.constant 0 : i32
    return %arg2, %arg1 : i32, i32
  }
  func.func @transform_4(%arg0: i32, %arg1: i32, %arg2: i32) -> (i32, i32) {
    %c0_i32 = arith.constant 0 : i32
    %c0_i32_0 = arith.constant 0 : i32
    return %c0_i32, %arg1 : i32, i32
  }
  func.func @transform_5(%arg0: i32, %arg1: i32, %arg2: i32) -> (i32, i32) {
    %c0_i32 = arith.constant 0 : i32
    return %arg0, %arg1 : i32, i32
  }
}

</mosaic_0001>

<bundles_post_ra>
// kernel: tpu_custom_call.1
= control target key start
LH: loop header
LB: loop body
LE: loop exit
PB: predicated region body
PF: predicated region fallthrough
CT: control target
= control target key end

     0   :  { %10 = vsyncpa [#allocation5], 0  ;;  %s436_s0 = inlined_call_operand.hbm [shape: bf16[16,32], index: 0, kind: input, shape index: {}]   ;;  %s437_s1 = inlined_call_operand.vmem [shape: f32[1,32], index: 1, kind: input, shape index: {}]   ;;  %s438_s2 = inlined_call_operand.vmem [shape: f32[1,32], index: 2, kind: input, shape index: {}]   ;;  %s439_s3 = inlined_call_operand.hbm [shape: bf16[32,96], index: 3, kind: input, shape index: {}]   ;;  %s440_s4 = inlined_call_operand.vmem [shape: f32[1,96], index: 4, kind: input, shape index: {}]   ;;  %s441_s5 = inlined_call_operand.hbm [shape: bf16[16,96], index: 5, kind: output, shape index: {}]  }
   0x1   :  { %11 = vsyncpa [#allocation8], 0 }
   0x2   :  { %12 = vsyncpa [#allocation6], 0  ;;  %s335_s18 = smov [#allocation4]   ;;  %s263_s22 = scalar_lea.hbm %s436_s0, 128 }
   0x3   :  { %s18_s19 = sshll.u32 %s335_s18, 4  ;;  %p264_p0 = scmp.ne.s32.totalorder %s436_s0, %s263_s22  ;;  %s19_s19 = int_to_ptr.vmem [resolvable:$true] %s18_s19 }
   0x4   :  { %p267_p1 = scmp.lt.u32.totalorder %s263_s22, %s436_s0 }
   0x6   :  { %p269_p2 = pnand %p267_p1, %p264_p0 }
   0x8   :  { %272 = shalt.err (!%p269_p2)
}
   0x9   :  { %s273_s27 = scalar_lea.vmem %s19_s19, 128  ;;  %p278_p4 = scmp.lt.s32.totalorder %s19_s19, %s19_s19 }
   0xa   :  { %p274_p3 = scmp.ne.s32.totalorder %s19_s19, %s273_s27  ;;  %p279_p5 = scmp.lt.s32.totalorder %s273_s27, %s273_s27 }
   0xc   :  { %p280_p6 = por %p279_p5, %p278_p4 }
   0xe   :  { %p281_p7 = pnand %p280_p6, %p274_p3 }
  0x10   :  { %284 = shalt.err (!%p281_p7)
}
  0x11   :  { %s336_s28 = smov 64   ;;  %s337_s29 = smov 4  }
  0x12   :  { %24 = dma.hbm_to_vmem [thread:$0]  %s436_s0, 128, %s19_s19, [#allocation5], %s336_s28, %s336_s28, %s337_s29  }
  0x13   :  { %s338_s7 = smov [#allocation7]   ;;  %s285_s11 = scalar_lea.hbm %s439_s3, 256 }
  0x14   :  { %s34_s8 = sshll.u32 %s338_s7, 4  ;;  %p286_p8 = scmp.ne.s32.totalorder %s439_s3, %s285_s11  ;;  %s35_s8 = int_to_ptr.vmem [resolvable:$true] %s34_s8 }
  0x15   :  { %p289_p9 = scmp.lt.u32.totalorder %s285_s11, %s439_s3 }
  0x17   :  { %p291_p10 = pnand %p289_p9, %p286_p8 }
  0x19   :  { %294 = shalt.err (!%p291_p10)
}
  0x1a   :  { %s295_s16 = scalar_lea.vmem %s35_s8, 256  ;;  %p300_p12 = scmp.lt.s32.totalorder %s35_s8, %s35_s8 }
  0x1b   :  { %p296_p11 = scmp.ne.s32.totalorder %s35_s8, %s295_s16  ;;  %p301_p13 = scmp.lt.s32.totalorder %s295_s16, %s295_s16 }
  0x1d   :  { %p302_p0 = por %p301_p13, %p300_p12 }
  0x1f   :  { %p303_p1 = pnand %p302_p0, %p296_p11 }
  0x21   :  { %306 = shalt.err (!%p303_p1)
}
  0x22   :  { %40 = dma.hbm_to_vmem [thread:$0]  %s439_s3, 256, %s35_s8, [#allocation8], %s336_s28, %s336_s28, %s337_s29  }
  0x23   :  { %329 = dma.done.wait [#allocation5], 128  }
  0x24   :  { %330 = vsyncadd [#allocation5], 4294967168 }
  0x25   :  { %331 = dma.done.wait [#allocation8], 256  }
  0x26   :  { %332 = vsyncadd [#allocation8], 4294967040  ;;  %v236_v0 = vld [vmem:[#allocation4] sm:$0xff]   ;;  %vm65_vm0 = vcmask 261120   ;;  %v257_v15 = vld [vmem:[#allocation7] sm:$0xff]   ;;  %vm54_vm1 = vcmask 785408  }
  0x27   :  { %v237_v1 = vunpack.c.l.bf16 %v236_v0  ;;  %v238_v2 = vunpack.c.h.bf16 %v236_v0  ;;  %v339_v16 = vmov 0.0   ;;  %v258_v17 = vld [vmem:[#allocation7 + $0x8] sm:$0xff]   ;;  %vm340_vm2 = vmmov 0   ;;  %v225_v26 = vld [vmem:[%s437_s1] ss:$0 sm:$0xff]  ;;  %s341_s21 = smov [#allocation9]  }
  0x28   :  { %242 = vmatprep.subr.bf16.mxu0 %v339_v16  ;;  %55 = vst.msk [vmem:[#allocation2] sm:$0xff] %vm54_vm1, %v339_v16  ;;  %56 = vst.msk [vmem:[#allocation2 + $0x8] sm:$0xff] %vm54_vm1, %v339_v16  ;;  %246 = vmatprep.mubr.msk.bf16.mxu0 %vm340_vm2, %v339_v16  ;;  %v226_v30 = vld [vmem:[%s438_s2] ss:$0 sm:$0xff]  ;;  %vm204_vm3 = vcmask 781312   ;;  %s212_s22 = sshll.u32 %s341_s21, 4  ;;  %s213_s22 = int_to_ptr.vmem [resolvable:$true] %s212_s22 }
  0x29   :  { %v66_v3 = vsel %vm65_vm0, %v237_v1, 0.0  ;;  %v69_v4 = vsel %vm65_vm0, %v238_v2, 0.0  ;;  %243 = vmatpush3.bf16.msra.mxu0 %v257_v15  ;;  %v230_v44 = vld [vmem:[%s440_s4] ss:$0 sm:$0xff]  ;;  %s307_s23 = scalar_lea.vmem %s213_s22, 128  ;;  %p312_p3 = scmp.lt.s32.totalorder %s213_s22, %s213_s22 }
  0x2a   :  { %67 = vadd.xlane.f32.xlu0 %v66_v3  ;;  %244 = vmatprep.subr.bf16.mxu0 %v339_v16  ;;  %p308_p2 = scmp.ne.s32.totalorder %s213_s22, %s307_s23  ;;  %p313_p4 = scmp.lt.s32.totalorder %s307_s23, %s307_s23 }
  0x2c   :  { %p314_p5 = por %p313_p4, %p312_p3 }
  0x2d   :  { %245 = vmatpush3.bf16.msra.mxu0 %v258_v17 }
  0x2e   :  { %70 = vadd.xlane.f32.xlu0 %v69_v4  ;;  %p315_p6 = pnand %p314_p5, %p308_p2 }
  0x2f   :  { %v114_v36 = vld [vmem:[#allocation2] sm:$0xff]  ;;  %v115_v38 = vld [vmem:[#allocation2 + $0x8] sm:$0xff] }
  0xb7   :  { %v68_v5 = vpop.xlane.xlu0 %67 }
  0xb8   :  { %v73_v6 = vmul.f32 0.03125, %v68_v5 }
  0xba   :  { %v75_v7 = vsub.f32 %v237_v1, %v73_v6 }
  0xbb   :  { %v71_v8 = vpop.xlane.xlu0 %70 }
  0xbc   :  { %v74_v9 = vmul.f32 0.03125, %v71_v8  ;;  %v77_v10 = vmul.f32 %v75_v7, %v75_v7 }
  0xbe   :  { %v76_v11 = vsub.f32 %v238_v2, %v74_v9  ;;  %v79_v12 = vsel %vm65_vm0, %v77_v10, 0.0 }
  0xbf   :  { %80 = vadd.xlane.f32.xlu1 %v79_v12 }
  0xc0   :  { %v78_v13 = vmul.f32 %v76_v11, %v76_v11 }
  0xc2   :  { %v82_v14 = vsel %vm65_vm0, %v78_v13, 0.0 }
  0xc3   :  { %83 = vadd.xlane.f32.xlu1 %v82_v14 }
 0x14c   :  { %v81_v18 = vpop.xlane.xlu1 %80 }
 0x14d   :  { %v85_v19 = vmul.f32 0.03125, %v81_v18 }
 0x14f   :  { %v87_v20 = vadd.f32 1e-06, %v85_v19 }
 0x150   :  { %v84_v21 = vpop.xlane.xlu1 %83 }
 0x151   :  { %259 = vrsqrt.f32 %v87_v20  ;;  %v86_v22 = vmul.f32 0.03125, %v84_v21 }
 0x153   :  { %v88_v23 = vadd.f32 1e-06, %v86_v22 }
 0x155   :  { %261 = vrsqrt.f32 %v88_v23 }
 0x15b   :  { %v260_v24 = vpop.eup %259 }
 0x15c   :  { %v91_v25 = vmul.f32 %v260_v24, %v75_v7 }
 0x15e   :  { %v100_v28 = vmul.f32 %v225_v26, %v91_v25 }
 0x15f   :  { %v262_v27 = vpop.eup %261 }
 0x160   :  { %v92_v29 = vmul.f32 %v262_v27, %v76_v11  ;;  %v109_v32 = vadd.f32 %v226_v30, %v100_v28 }
 0x162   :  { %v101_v31 = vmul.f32 %v225_v26, %v92_v29 }
 0x164   :  { %v110_v33 = vadd.f32 %v226_v30, %v101_v31 }
 0x166   :  { %v111_v34 = vpack.c.bf16 %v110_v33, %v109_v32 }
 0x168   :  { %112 = vst.msk [vmem:[#allocation3] sm:$0xff] %vm65_vm0, %v111_v34 }
 0x16f   :  { %v113_v35 = vld [vmem:[#allocation3] sm:$0xff] }
 0x170   :  { %247 = vmatmul.mubr.msk.bf16.vlgmr.msra.gmra.mrb[0].mxu0 %vm65_vm0, %v113_v35 }
 0x243   :  { %v170_v37 = vpop.f32.mrb[0].mxu0 }
 0x244   :  { %v177_v39 = vadd.f32 %v170_v37, %v114_v36  ;;  %v248_v40 = vpop.f32.mrb[1].mxu0 }
 0x245   :  { %v173_v41 = vpop.f32.mrb[2].mxu0 }
 0x246   :  { %180 = vst.msk [vmem:[#allocation2] sm:$0xff] %vm54_vm1, %v177_v39  ;;  %v178_v42 = vadd.f32 %v173_v41, %v115_v38  ;;  %v249_v43 = vpop.f32.mrb[3].mxu0 }
 0x248   :  { %181 = vst.msk [vmem:[#allocation2 + $0x8] sm:$0xff] %vm54_vm1, %v178_v42 }
 0x24d   :  { %v185_v45 = vld [vmem:[#allocation2] sm:$0xff] }
 0x24e   :  { %v194_v46 = vadd.f32 %v230_v44, %v185_v45 }
 0x24f   :  { %v186_v47 = vld [vmem:[#allocation2 + $0x8] sm:$0xff] }
 0x250   :  { %v195_v48 = vadd.f32 %v230_v44, %v186_v47  ;;  %v233_v49 = vpack.c.bf16 %v194_v46, %v194_v46 }
 0x252   :  { %v234_v50 = vpack.c.bf16 %v195_v48, %v195_v48  ;;  %205 = vst.msk [vmem:[#allocation9] sm:$0xf] %vm204_vm3, %v233_v49 }
 0x254   :  { %206 = vst.msk [vmem:[#allocation9 + $0x4] sm:$0xf] %vm204_vm3, %v234_v50 }
 0x255   :  { %318 = shalt.err (!%p315_p6)
}
 0x256   :  { %s319_s25 = scalar_lea.hbm %s441_s5, 128 }
 0x257   :  { %p320_p7 = scmp.ne.s32.totalorder %s441_s5, %s319_s25  ;;  %p323_p8 = scmp.lt.u32.totalorder %s319_s25, %s441_s5 }
 0x259   :  { %p325_p9 = pnand %p323_p8, %p320_p7 }
 0x25b   :  { %328 = shalt.err (!%p325_p9)
}
 0x25c   :  { %218 = dma.vmem_to_hbm [thread:$0]  %s213_s22, 128, %s441_s5, [#allocation6], %s336_s28, %s336_s28, %s337_s29  }
 0x25d   :  { %333 = dma.done.wait [#allocation6], 128  }
 0x25e   :  { %334 = vsyncadd [#allocation6], 4294967168 }
 0x25f   :  { %222 = vsyncpa [#allocation5], 1 }
 0x260   :  { %223 = vsyncpa [#allocation8], 1 }
 0x261   :  { %224 = vsyncpa [#allocation6], 1 }

</bundles_post_ra>
